<compile_context>
chip_gen: v6e
topology: v6e:2x2x1
jax: 0.10.0
libtpu: 0.0.40
codegen_flags: <defaults>
</compile_context>

<pallas_src>
import jax
import jax.numpy as jnp
import numpy as np
from jax import lax
from jax.experimental import pallas as pl
from jax.experimental.pallas import tpu as pltpu

BN_EPS = 1e-5
LEAKY_SLOPE = 0.2


def _round_up(x, m):
    return (x + m - 1) // m * m


def _make_conv_stats_kernel(Cout, Wp, Lq):
    """Pass 1: conv (27 shifted taps, bf16 MXU dots, f32 acc) + masked partial moments."""

    def kernel(x_ref, w_ref, mask_ref, conv_ref, stat_ref):
        # x_ref   : (Dp, Cin, Lp)  bf16   -- padded slab for this batch element
        # w_ref   : (27, Cout, Cin) bf16  -- tap t = kd*9 + kh*3 + kw
        # mask_ref: (1, Lq) f32           -- 1.0 on valid (non-garbage) columns
        # conv_ref: (Cout, Lq) f32        -- conv output for this (n, d) slab
        # stat_ref: (Cout, 2) f32         -- per-block [sum, sum_sq] over valid cols
        d = pl.program_id(1)
        acc = jnp.zeros((Cout, Lq), dtype=jnp.float32)
        for kd in range(3):
            x_d = x_ref[d + kd]                              # (Cin, Lp) bf16
            for kh in range(3):
                for kw in range(3):
                    off = kh * Wp + kw                       # static lane offset
                    xs = x_d[:, off:off + Lq]                # (Cin, Lq) bf16
                    w_t = w_ref[kd * 9 + kh * 3 + kw]        # (Cout, Cin) bf16
                    acc = acc + jnp.dot(w_t, xs,
                                        preferred_element_type=jnp.float32)
        conv_ref[...] = acc

        m = mask_ref[...]                                    # (1, Lq)
        am = acc * m
        stat_ref[:, 0:1] = jnp.sum(am, axis=1, keepdims=True)
        stat_ref[:, 1:2] = jnp.sum(am * acc, axis=1, keepdims=True)

    return kernel


def _bn_lrelu_kernel(conv_ref, scale_ref, shift_ref, out_ref):
    """Pass 2: y = conv*scale + shift (folded BN affine), then LeakyReLU(0.2). All f32."""
    y = conv_ref[...] * scale_ref[...] + shift_ref[...]
    out_ref[...] = jnp.where(y > 0, y, LEAKY_SLOPE * y)


@jax.jit
def conv_block_3d_pallas(x_ncdhw, weight_oidhw, bias, gamma, beta):
    """x_ncdhw: (N, Cin, D, H, W) f32. Returns (N, Cout, D, H, W) f32."""
    N, Cin, D, H, W = x_ncdhw.shape
    Cout = weight_oidhw.shape[0]
    del bias  # a per-channel constant before training-mode BatchNorm is exactly
    #           cancelled by the mean subtraction -> mathematically a no-op.

    Dp, Hp, Wp = D + 2, H + 2, W + 2
    Lq = H * Wp                               # flattened output row (2 garbage cols/row)
    Lp = _round_up(max(Lq + 2 * Wp + 2, 128), 128)   # padded flat input, covers max tap offset

    # --- glue: layout only (no im2col) ---
    # (N, Cin, D, H, W) -> (N, D, Cin, H, W); zero-pad D/H/W by 1; flatten (Hp, Wp)
    # into the lane dim; zero-pad lanes to Lp (also provides tap-overrun slack).
    xt = jnp.transpose(x_ncdhw, (0, 2, 1, 3, 4))
    xp = jnp.pad(xt, ((0, 0), (1, 1), (0, 0), (1, 1), (1, 1)))
    xflat = xp.reshape(N, Dp, Cin, Hp * Wp)
    xflat = jnp.pad(xflat, ((0, 0), (0, 0), (0, 0), (0, Lp - Hp * Wp)))
    x_bf16 = xflat.astype(jnp.bfloat16)

    # weights: (Cout, Cin, 3,3,3) -> (27, Cout, Cin), tap order kd*9 + kh*3 + kw.
    w27 = jnp.transpose(weight_oidhw, (2, 3, 4, 0, 1)).reshape(27, Cout, Cin)
    w27 = w27.astype(jnp.bfloat16)

    # validity mask over the Lq columns (exclude garbage columns from BN stats).
    mask = (jnp.arange(Lq, dtype=jnp.int32) % Wp < W).astype(jnp.float32).reshape(1, Lq)

    cparams = pltpu.CompilerParams(
        dimension_semantics=("parallel", "parallel"),
        vmem_limit_bytes=48 * 1024 * 1024,
    )

    # ---------------- pass 1: conv + partial BN moments ----------------
    pass1_cost = pl.CostEstimate(
        flops=2 * N * D * Lq * 27 * Cin * Cout,
        transcendentals=0,
        bytes_accessed=(x_bf16.size * 2 + w27.size * 2 + mask.size * 4
                        + N * D * Cout * Lq * 4 + N * D * Cout * 2 * 4),
    )
    conv_out, stats = pl.pallas_call(
        _make_conv_stats_kernel(Cout, Wp, Lq),
        grid=(N, D),
        in_specs=[
            pl.BlockSpec((None, Dp, Cin, Lp), lambda n, d: (n, 0, 0, 0)),  # per-n resident
            pl.BlockSpec((27, Cout, Cin), lambda n, d: (0, 0, 0)),         # weights resident
            pl.BlockSpec((1, Lq), lambda n, d: (0, 0)),                    # mask resident
        ],
        out_specs=[
            pl.BlockSpec((None, None, Cout, Lq), lambda n, d: (n, d, 0, 0)),
            pl.BlockSpec((None, None, Cout, 2), lambda n, d: (n, d, 0, 0)),
        ],
        out_shape=[
            jax.ShapeDtypeStruct((N, D, Cout, Lq), jnp.float32),
            jax.ShapeDtypeStruct((N, D, Cout, 2), jnp.float32),
        ],
        compiler_params=cparams,
        cost_estimate=pass1_cost,
    )(x_bf16, w27, mask)

    # ---------------- tiny cross-block reduction (glue) ----------------
    count = float(N * D * H * W)
    ssum = jnp.sum(stats[..., 0], axis=(0, 1))                 # (Cout,)
    ssq = jnp.sum(stats[..., 1], axis=(0, 1))                  # (Cout,)
    mean = ssum / count
    var = jnp.maximum(ssq / count - mean * mean, 0.0)          # biased variance (BN training)
    inv_std = lax.rsqrt(var + BN_EPS)
    g32 = gamma.astype(jnp.float32)
    b32 = beta.astype(jnp.float32)
    scale = (g32 * inv_std).reshape(Cout, 1)
    shift = (b32 - mean * g32 * inv_std).reshape(Cout, 1)

    # ---------------- pass 2: BN affine + LeakyReLU ----------------
    pass2_cost = pl.CostEstimate(
        flops=4 * N * D * Cout * Lq,
        transcendentals=0,
        bytes_accessed=2 * N * D * Cout * Lq * 4,
    )
    out4 = pl.pallas_call(
        _bn_lrelu_kernel,
        grid=(N, D),
        in_specs=[
            pl.BlockSpec((None, None, Cout, Lq), lambda n, d: (n, d, 0, 0)),
            pl.BlockSpec((Cout, 1), lambda n, d: (0, 0)),
            pl.BlockSpec((Cout, 1), lambda n, d: (0, 0)),
        ],
        out_specs=pl.BlockSpec((None, None, Cout, Lq), lambda n, d: (n, d, 0, 0)),
        out_shape=jax.ShapeDtypeStruct((N, D, Cout, Lq), jnp.float32),
        compiler_params=cparams,
        cost_estimate=pass2_cost,
    )(conv_out, scale, shift)

    # crop garbage columns and return NCDHW.
    out = out4.reshape(N, D, Cout, H, Wp)[..., :W]             # (N, D, Cout, H, W)
    return jnp.transpose(out, (0, 2, 1, 3, 4))                 # (N, Cout, D, H, W)


def _reference(x_ncdhw, weight_oidhw, bias, gamma, beta):
    """Plain-JAX reference mirroring the PyTorch module in training mode.

    The matmul operands in the kernel are bf16 (per TPU MXU guidance), so the
    reference uses the same bf16-rounded inputs; everything else is f32.
    """
    xq = x_ncdhw.astype(jnp.bfloat16).astype(jnp.float32)
    wq = weight_oidhw.astype(jnp.bfloat16).astype(jnp.float32)
    conv = lax.conv_general_dilated(
        xq, wq,
        window_strides=(1, 1, 1),
        padding=((1, 1), (1, 1), (1, 1)),
        dimension_numbers=("NCDHW", "OIDHW", "NCDHW"),
        precision=lax.Precision.HIGHEST,
    ) + bias[None, :, None, None, None]
    mean = conv.mean(axis=(0, 2, 3, 4), keepdims=True)
    var = ((conv - mean) ** 2).mean(axis=(0, 2, 3, 4), keepdims=True)
    y = (conv - mean) / jnp.sqrt(var + BN_EPS)
    y = y * gamma[None, :, None, None, None] + beta[None, :, None, None, None]
    return jnp.where(y > 0, y, LEAKY_SLOPE * y)


if __name__ == "__main__":
    key = jax.random.PRNGKey(0)
    k_x, k_w, k_b, k_g, k_beta = jax.random.split(key, 5)

    # Small shapes consistent with the module: N=2, in_dim=4, out_dim=8, D=H=W=8.
    N, Cin, Cout, D, H, W = 2, 4, 8, 8, 8, 8

    x = jax.random.normal(k_x, (N, Cin, D, H, W), dtype=jnp.float32)
    weight = jax.random.normal(k_w, (Cout, Cin, 3, 3, 3), dtype=jnp.float32) * 0.1
    bias = jax.random.normal(k_b, (Cout,), dtype=jnp.float32) * 0.1
    gamma = 1.0 + 0.1 * jax.random.normal(k_g, (Cout,), dtype=jnp.float32)
    beta = 0.1 * jax.random.normal(k_beta, (Cout,), dtype=jnp.float32)

    out = conv_block_3d_pallas(x, weight, bias, gamma, beta)
    out = jax.block_until_ready(out)

    ref = jax.block_until_ready(_reference(x, weight, bias, gamma, beta))
    assert out.shape == (N, Cout, D, H, W)
    np.testing.assert_allclose(np.asarray(out), np.asarray(ref), rtol=2e-3, atol=2e-3)

    print("KERNEL_OK")
</pallas_src>

<mosaic_0001>
module attributes {stable_mosaic.version = 11 : i64} {
  func.func @kernel(%arg0: i32, %arg1: i32, %arg2: memref<1x10x4x128xbf16, #tpu.memory_space<vmem>>, %arg3: memref<27x8x4xbf16, #tpu.memory_space<vmem>>, %arg4: memref<1x80xf32, #tpu.memory_space<vmem>>, %arg5: memref<1x1x8x80xf32, #tpu.memory_space<vmem>>, %arg6: memref<1x1x8x2xf32, #tpu.memory_space<vmem>>) attributes {dimension_semantics = [#tpu.dimension_semantics<parallel>, #tpu.dimension_semantics<parallel>], iteration_bounds = array<i64: 2, 8>, scalar_prefetch = 0 : i64, scratch_operands = 0 : i64, tpu.core_type = #tpu.core_type<tc>, window_params = [{transform_indices = @transform_0, window_bounds = array<i64: 1, 10, 4, 128>}, {pipeline_mode = #tpu.pipeline_mode<synchronous>, transform_indices = @transform_1, window_bounds = array<i64: 27, 8, 4>}, {pipeline_mode = #tpu.pipeline_mode<synchronous>, transform_indices = @transform_2, window_bounds = array<i64: 1, 80>}, {transform_indices = @transform_3, window_bounds = array<i64: 1, 1, 8, 80>}, {transform_indices = @transform_4, window_bounds = array<i64: 1, 1, 8, 2>}]} {
    %cst = arith.constant 0.000000e+00 : f32
    %0 = vector.broadcast %cst : f32 to vector<8x80xf32>
    %c0_i32 = arith.constant 0 : i32
    %1 = arith.addi %arg1, %c0_i32 : i32
    %c0 = arith.constant 0 : index
    %2 = arith.index_cast %1 : i32 to index
    %c0_0 = arith.constant 0 : index
    %c0_1 = arith.constant 0 : index
    %3 = vector.load %arg2[%c0, %2, %c0_0, %c0_1] : memref<1x10x4x128xbf16, #tpu.memory_space<vmem>>, vector<1x1x4x128xbf16>
    %4 = vector.shape_cast %3 : vector<1x1x4x128xbf16> to vector<4x128xbf16>
    %5 = vector.extract_strided_slice %4 {offsets = [0, 0], sizes = [4, 80], strides = [1, 1]} : vector<4x128xbf16> to vector<4x80xbf16>
    %c0_2 = arith.constant 0 : index
    %c0_3 = arith.constant 0 : index
    %c0_4 = arith.constant 0 : index
    %6 = vector.load %arg3[%c0_2, %c0_3, %c0_4] : memref<27x8x4xbf16, #tpu.memory_space<vmem>>, vector<1x8x4xbf16>
    %7 = vector.shape_cast %6 : vector<1x8x4xbf16> to vector<8x4xbf16>
    %cst_5 = arith.constant dense<0.000000e+00> : vector<8x80xf32>
    %8 = tpu.matmul %7, %5, %cst_5 {dimension_numbers = #tpu.dot_dimension_numbers<[1], [0], [0], [1], [0, 0, 1, 1], [], []>} : vector<8x4xbf16>, vector<4x80xbf16>, vector<8x80xf32> -> vector<8x80xf32>
    %9 = arith.addf %0, %8 : vector<8x80xf32>
    %10 = vector.extract_strided_slice %4 {offsets = [0, 1], sizes = [4, 80], strides = [1, 1]} : vector<4x128xbf16> to vector<4x80xbf16>
    %c1 = arith.constant 1 : index
    %c0_6 = arith.constant 0 : index
    %c0_7 = arith.constant 0 : index
    %11 = vector.load %arg3[%c1, %c0_6, %c0_7] : memref<27x8x4xbf16, #tpu.memory_space<vmem>>, vector<1x8x4xbf16>
    %12 = vector.shape_cast %11 : vector<1x8x4xbf16> to vector<8x4xbf16>
    %cst_8 = arith.constant dense<0.000000e+00> : vector<8x80xf32>
    %13 = tpu.matmul %12, %10, %cst_8 {dimension_numbers = #tpu.dot_dimension_numbers<[1], [0], [0], [1], [0, 0, 1, 1], [], []>} : vector<8x4xbf16>, vector<4x80xbf16>, vector<8x80xf32> -> vector<8x80xf32>
    %14 = arith.addf %9, %13 : vector<8x80xf32>
    %15 = vector.extract_strided_slice %4 {offsets = [0, 2], sizes = [4, 80], strides = [1, 1]} : vector<4x128xbf16> to vector<4x80xbf16>
    %c2 = arith.constant 2 : index
    %c0_9 = arith.constant 0 : index
    %c0_10 = arith.constant 0 : index
    %16 = vector.load %arg3[%c2, %c0_9, %c0_10] : memref<27x8x4xbf16, #tpu.memory_space<vmem>>, vector<1x8x4xbf16>
    %17 = vector.shape_cast %16 : vector<1x8x4xbf16> to vector<8x4xbf16>
    %cst_11 = arith.constant dense<0.000000e+00> : vector<8x80xf32>
    %18 = tpu.matmul %17, %15, %cst_11 {dimension_numbers = #tpu.dot_dimension_numbers<[1], [0], [0], [1], [0, 0, 1, 1], [], []>} : vector<8x4xbf16>, vector<4x80xbf16>, vector<8x80xf32> -> vector<8x80xf32>
    %19 = arith.addf %14, %18 : vector<8x80xf32>
    %20 = vector.extract_strided_slice %4 {offsets = [0, 10], sizes = [4, 80], strides = [1, 1]} : vector<4x128xbf16> to vector<4x80xbf16>
    %c3 = arith.constant 3 : index
    %c0_12 = arith.constant 0 : index
    %c0_13 = arith.constant 0 : index
    %21 = vector.load %arg3[%c3, %c0_12, %c0_13] : memref<27x8x4xbf16, #tpu.memory_space<vmem>>, vector<1x8x4xbf16>
    %22 = vector.shape_cast %21 : vector<1x8x4xbf16> to vector<8x4xbf16>
    %cst_14 = arith.constant dense<0.000000e+00> : vector<8x80xf32>
    %23 = tpu.matmul %22, %20, %cst_14 {dimension_numbers = #tpu.dot_dimension_numbers<[1], [0], [0], [1], [0, 0, 1, 1], [], []>} : vector<8x4xbf16>, vector<4x80xbf16>, vector<8x80xf32> -> vector<8x80xf32>
    %24 = arith.addf %19, %23 : vector<8x80xf32>
    %25 = vector.extract_strided_slice %4 {offsets = [0, 11], sizes = [4, 80], strides = [1, 1]} : vector<4x128xbf16> to vector<4x80xbf16>
    %c4 = arith.constant 4 : index
    %c0_15 = arith.constant 0 : index
    %c0_16 = arith.constant 0 : index
    %26 = vector.load %arg3[%c4, %c0_15, %c0_16] : memref<27x8x4xbf16, #tpu.memory_space<vmem>>, vector<1x8x4xbf16>
    %27 = vector.shape_cast %26 : vector<1x8x4xbf16> to vector<8x4xbf16>
    %cst_17 = arith.constant dense<0.000000e+00> : vector<8x80xf32>
    %28 = tpu.matmul %27, %25, %cst_17 {dimension_numbers = #tpu.dot_dimension_numbers<[1], [0], [0], [1], [0, 0, 1, 1], [], []>} : vector<8x4xbf16>, vector<4x80xbf16>, vector<8x80xf32> -> vector<8x80xf32>
    %29 = arith.addf %24, %28 : vector<8x80xf32>
    %30 = vector.extract_strided_slice %4 {offsets = [0, 12], sizes = [4, 80], strides = [1, 1]} : vector<4x128xbf16> to vector<4x80xbf16>
    %c5 = arith.constant 5 : index
    %c0_18 = arith.constant 0 : index
    %c0_19 = arith.constant 0 : index
    %31 = vector.load %arg3[%c5, %c0_18, %c0_19] : memref<27x8x4xbf16, #tpu.memory_space<vmem>>, vector<1x8x4xbf16>
    %32 = vector.shape_cast %31 : vector<1x8x4xbf16> to vector<8x4xbf16>
    %cst_20 = arith.constant dense<0.000000e+00> : vector<8x80xf32>
    %33 = tpu.matmul %32, %30, %cst_20 {dimension_numbers = #tpu.dot_dimension_numbers<[1], [0], [0], [1], [0, 0, 1, 1], [], []>} : vector<8x4xbf16>, vector<4x80xbf16>, vector<8x80xf32> -> vector<8x80xf32>
    %34 = arith.addf %29, %33 : vector<8x80xf32>
    %35 = vector.extract_strided_slice %4 {offsets = [0, 20], sizes = [4, 80], strides = [1, 1]} : vector<4x128xbf16> to vector<4x80xbf16>
    %c6 = arith.constant 6 : index
    %c0_21 = arith.constant 0 : index
    %c0_22 = arith.constant 0 : index
    %36 = vector.load %arg3[%c6, %c0_21, %c0_22] : memref<27x8x4xbf16, #tpu.memory_space<vmem>>, vector<1x8x4xbf16>
    %37 = vector.shape_cast %36 : vector<1x8x4xbf16> to vector<8x4xbf16>
    %cst_23 = arith.constant dense<0.000000e+00> : vector<8x80xf32>
    %38 = tpu.matmul %37, %35, %cst_23 {dimension_numbers = #tpu.dot_dimension_numbers<[1], [0], [0], [1], [0, 0, 1, 1], [], []>} : vector<8x4xbf16>, vector<4x80xbf16>, vector<8x80xf32> -> vector<8x80xf32>
    %39 = arith.addf %34, %38 : vector<8x80xf32>
    %40 = vector.extract_strided_slice %4 {offsets = [0, 21], sizes = [4, 80], strides = [1, 1]} : vector<4x128xbf16> to vector<4x80xbf16>
    %c7 = arith.constant 7 : index
    %c0_24 = arith.constant 0 : index
    %c0_25 = arith.constant 0 : index
    %41 = vector.load %arg3[%c7, %c0_24, %c0_25] : memref<27x8x4xbf16, #tpu.memory_space<vmem>>, vector<1x8x4xbf16>
    %42 = vector.shape_cast %41 : vector<1x8x4xbf16> to vector<8x4xbf16>
    %cst_26 = arith.constant dense<0.000000e+00> : vector<8x80xf32>
    %43 = tpu.matmul %42, %40, %cst_26 {dimension_numbers = #tpu.dot_dimension_numbers<[1], [0], [0], [1], [0, 0, 1, 1], [], []>} : vector<8x4xbf16>, vector<4x80xbf16>, vector<8x80xf32> -> vector<8x80xf32>
    %44 = arith.addf %39, %43 : vector<8x80xf32>
    %45 = vector.extract_strided_slice %4 {offsets = [0, 22], sizes = [4, 80], strides = [1, 1]} : vector<4x128xbf16> to vector<4x80xbf16>
    %c8 = arith.constant 8 : index
    %c0_27 = arith.constant 0 : index
    %c0_28 = arith.constant 0 : index
    %46 = vector.load %arg3[%c8, %c0_27, %c0_28] : memref<27x8x4xbf16, #tpu.memory_space<vmem>>, vector<1x8x4xbf16>
    %47 = vector.shape_cast %46 : vector<1x8x4xbf16> to vector<8x4xbf16>
    %cst_29 = arith.constant dense<0.000000e+00> : vector<8x80xf32>
    %48 = tpu.matmul %47, %45, %cst_29 {dimension_numbers = #tpu.dot_dimension_numbers<[1], [0], [0], [1], [0, 0, 1, 1], [], []>} : vector<8x4xbf16>, vector<4x80xbf16>, vector<8x80xf32> -> vector<8x80xf32>
    %49 = arith.addf %44, %48 : vector<8x80xf32>
    %c1_i32 = arith.constant 1 : i32
    %50 = arith.addi %arg1, %c1_i32 : i32
    %c0_30 = arith.constant 0 : index
    %51 = arith.index_cast %50 : i32 to index
    %c0_31 = arith.constant 0 : index
    %c0_32 = arith.constant 0 : index
    %52 = vector.load %arg2[%c0_30, %51, %c0_31, %c0_32] : memref<1x10x4x128xbf16, #tpu.memory_space<vmem>>, vector<1x1x4x128xbf16>
    %53 = vector.shape_cast %52 : vector<1x1x4x128xbf16> to vector<4x128xbf16>
    %54 = vector.extract_strided_slice %53 {offsets = [0, 0], sizes = [4, 80], strides = [1, 1]} : vector<4x128xbf16> to vector<4x80xbf16>
    %c9 = arith.constant 9 : index
    %c0_33 = arith.constant 0 : index
    %c0_34 = arith.constant 0 : index
    %55 = vector.load %arg3[%c9, %c0_33, %c0_34] : memref<27x8x4xbf16, #tpu.memory_space<vmem>>, vector<1x8x4xbf16>
    %56 = vector.shape_cast %55 : vector<1x8x4xbf16> to vector<8x4xbf16>
    %cst_35 = arith.constant dense<0.000000e+00> : vector<8x80xf32>
    %57 = tpu.matmul %56, %54, %cst_35 {dimension_numbers = #tpu.dot_dimension_numbers<[1], [0], [0], [1], [0, 0, 1, 1], [], []>} : vector<8x4xbf16>, vector<4x80xbf16>, vector<8x80xf32> -> vector<8x80xf32>
    %58 = arith.addf %49, %57 : vector<8x80xf32>
    %59 = vector.extract_strided_slice %53 {offsets = [0, 1], sizes = [4, 80], strides = [1, 1]} : vector<4x128xbf16> to vector<4x80xbf16>
    %c10 = arith.constant 10 : index
    %c0_36 = arith.constant 0 : index
    %c0_37 = arith.constant 0 : index
    %60 = vector.load %arg3[%c10, %c0_36, %c0_37] : memref<27x8x4xbf16, #tpu.memory_space<vmem>>, vector<1x8x4xbf16>
    %61 = vector.shape_cast %60 : vector<1x8x4xbf16> to vector<8x4xbf16>
    %cst_38 = arith.constant dense<0.000000e+00> : vector<8x80xf32>
    %62 = tpu.matmul %61, %59, %cst_38 {dimension_numbers = #tpu.dot_dimension_numbers<[1], [0], [0], [1], [0, 0, 1, 1], [], []>} : vector<8x4xbf16>, vector<4x80xbf16>, vector<8x80xf32> -> vector<8x80xf32>
    %63 = arith.addf %58, %62 : vector<8x80xf32>
    %64 = vector.extract_strided_slice %53 {offsets = [0, 2], sizes = [4, 80], strides = [1, 1]} : vector<4x128xbf16> to vector<4x80xbf16>
    %c11 = arith.constant 11 : index
    %c0_39 = arith.constant 0 : index
    %c0_40 = arith.constant 0 : index
    %65 = vector.load %arg3[%c11, %c0_39, %c0_40] : memref<27x8x4xbf16, #tpu.memory_space<vmem>>, vector<1x8x4xbf16>
    %66 = vector.shape_cast %65 : vector<1x8x4xbf16> to vector<8x4xbf16>
    %cst_41 = arith.constant dense<0.000000e+00> : vector<8x80xf32>
    %67 = tpu.matmul %66, %64, %cst_41 {dimension_numbers = #tpu.dot_dimension_numbers<[1], [0], [0], [1], [0, 0, 1, 1], [], []>} : vector<8x4xbf16>, vector<4x80xbf16>, vector<8x80xf32> -> vector<8x80xf32>
    %68 = arith.addf %63, %67 : vector<8x80xf32>
    %69 = vector.extract_strided_slice %53 {offsets = [0, 10], sizes = [4, 80], strides = [1, 1]} : vector<4x128xbf16> to vector<4x80xbf16>
    %c12 = arith.constant 12 : index
    %c0_42 = arith.constant 0 : index
    %c0_43 = arith.constant 0 : index
    %70 = vector.load %arg3[%c12, %c0_42, %c0_43] : memref<27x8x4xbf16, #tpu.memory_space<vmem>>, vector<1x8x4xbf16>
    %71 = vector.shape_cast %70 : vector<1x8x4xbf16> to vector<8x4xbf16>
    %cst_44 = arith.constant dense<0.000000e+00> : vector<8x80xf32>
    %72 = tpu.matmul %71, %69, %cst_44 {dimension_numbers = #tpu.dot_dimension_numbers<[1], [0], [0], [1], [0, 0, 1, 1], [], []>} : vector<8x4xbf16>, vector<4x80xbf16>, vector<8x80xf32> -> vector<8x80xf32>
    %73 = arith.addf %68, %72 : vector<8x80xf32>
    %74 = vector.extract_strided_slice %53 {offsets = [0, 11], sizes = [4, 80], strides = [1, 1]} : vector<4x128xbf16> to vector<4x80xbf16>
    %c13 = arith.constant 13 : index
    %c0_45 = arith.constant 0 : index
    %c0_46 = arith.constant 0 : index
    %75 = vector.load %arg3[%c13, %c0_45, %c0_46] : memref<27x8x4xbf16, #tpu.memory_space<vmem>>, vector<1x8x4xbf16>
    %76 = vector.shape_cast %75 : vector<1x8x4xbf16> to vector<8x4xbf16>
    %cst_47 = arith.constant dense<0.000000e+00> : vector<8x80xf32>
    %77 = tpu.matmul %76, %74, %cst_47 {dimension_numbers = #tpu.dot_dimension_numbers<[1], [0], [0], [1], [0, 0, 1, 1], [], []>} : vector<8x4xbf16>, vector<4x80xbf16>, vector<8x80xf32> -> vector<8x80xf32>
    %78 = arith.addf %73, %77 : vector<8x80xf32>
    %79 = vector.extract_strided_slice %53 {offsets = [0, 12], sizes = [4, 80], strides = [1, 1]} : vector<4x128xbf16> to vector<4x80xbf16>
    %c14 = arith.constant 14 : index
    %c0_48 = arith.constant 0 : index
    %c0_49 = arith.constant 0 : index
    %80 = vector.load %arg3[%c14, %c0_48, %c0_49] : memref<27x8x4xbf16, #tpu.memory_space<vmem>>, vector<1x8x4xbf16>
    %81 = vector.shape_cast %80 : vector<1x8x4xbf16> to vector<8x4xbf16>
    %cst_50 = arith.constant dense<0.000000e+00> : vector<8x80xf32>
    %82 = tpu.matmul %81, %79, %cst_50 {dimension_numbers = #tpu.dot_dimension_numbers<[1], [0], [0], [1], [0, 0, 1, 1], [], []>} : vector<8x4xbf16>, vector<4x80xbf16>, vector<8x80xf32> -> vector<8x80xf32>
    %83 = arith.addf %78, %82 : vector<8x80xf32>
    %84 = vector.extract_strided_slice %53 {offsets = [0, 20], sizes = [4, 80], strides = [1, 1]} : vector<4x128xbf16> to vector<4x80xbf16>
    %c15 = arith.constant 15 : index
    %c0_51 = arith.constant 0 : index
    %c0_52 = arith.constant 0 : index
    %85 = vector.load %arg3[%c15, %c0_51, %c0_52] : memref<27x8x4xbf16, #tpu.memory_space<vmem>>, vector<1x8x4xbf16>
    %86 = vector.shape_cast %85 : vector<1x8x4xbf16> to vector<8x4xbf16>
    %cst_53 = arith.constant dense<0.000000e+00> : vector<8x80xf32>
    %87 = tpu.matmul %86, %84, %cst_53 {dimension_numbers = #tpu.dot_dimension_numbers<[1], [0], [0], [1], [0, 0, 1, 1], [], []>} : vector<8x4xbf16>, vector<4x80xbf16>, vector<8x80xf32> -> vector<8x80xf32>
    %88 = arith.addf %83, %87 : vector<8x80xf32>
    %89 = vector.extract_strided_slice %53 {offsets = [0, 21], sizes = [4, 80], strides = [1, 1]} : vector<4x128xbf16> to vector<4x80xbf16>
    %c16 = arith.constant 16 : index
    %c0_54 = arith.constant 0 : index
    %c0_55 = arith.constant 0 : index
    %90 = vector.load %arg3[%c16, %c0_54, %c0_55] : memref<27x8x4xbf16, #tpu.memory_space<vmem>>, vector<1x8x4xbf16>
    %91 = vector.shape_cast %90 : vector<1x8x4xbf16> to vector<8x4xbf16>
    %cst_56 = arith.constant dense<0.000000e+00> : vector<8x80xf32>
    %92 = tpu.matmul %91, %89, %cst_56 {dimension_numbers = #tpu.dot_dimension_numbers<[1], [0], [0], [1], [0, 0, 1, 1], [], []>} : vector<8x4xbf16>, vector<4x80xbf16>, vector<8x80xf32> -> vector<8x80xf32>
    %93 = arith.addf %88, %92 : vector<8x80xf32>
    %94 = vector.extract_strided_slice %53 {offsets = [0, 22], sizes = [4, 80], strides = [1, 1]} : vector<4x128xbf16> to vector<4x80xbf16>
    %c17 = arith.constant 17 : index
    %c0_57 = arith.constant 0 : index
    %c0_58 = arith.constant 0 : index
    %95 = vector.load %arg3[%c17, %c0_57, %c0_58] : memref<27x8x4xbf16, #tpu.memory_space<vmem>>, vector<1x8x4xbf16>
    %96 = vector.shape_cast %95 : vector<1x8x4xbf16> to vector<8x4xbf16>
    %cst_59 = arith.constant dense<0.000000e+00> : vector<8x80xf32>
    %97 = tpu.matmul %96, %94, %cst_59 {dimension_numbers = #tpu.dot_dimension_numbers<[1], [0], [0], [1], [0, 0, 1, 1], [], []>} : vector<8x4xbf16>, vector<4x80xbf16>, vector<8x80xf32> -> vector<8x80xf32>
    %98 = arith.addf %93, %97 : vector<8x80xf32>
    %c2_i32 = arith.constant 2 : i32
    %99 = arith.addi %arg1, %c2_i32 : i32
    %c0_60 = arith.constant 0 : index
    %100 = arith.index_cast %99 : i32 to index
    %c0_61 = arith.constant 0 : index
    %c0_62 = arith.constant 0 : index
    %101 = vector.load %arg2[%c0_60, %100, %c0_61, %c0_62] : memref<1x10x4x128xbf16, #tpu.memory_space<vmem>>, vector<1x1x4x128xbf16>
    %102 = vector.shape_cast %101 : vector<1x1x4x128xbf16> to vector<4x128xbf16>
    %103 = vector.extract_strided_slice %102 {offsets = [0, 0], sizes = [4, 80], strides = [1, 1]} : vector<4x128xbf16> to vector<4x80xbf16>
    %c18 = arith.constant 18 : index
    %c0_63 = arith.constant 0 : index
    %c0_64 = arith.constant 0 : index
    %104 = vector.load %arg3[%c18, %c0_63, %c0_64] : memref<27x8x4xbf16, #tpu.memory_space<vmem>>, vector<1x8x4xbf16>
    %105 = vector.shape_cast %104 : vector<1x8x4xbf16> to vector<8x4xbf16>
    %cst_65 = arith.constant dense<0.000000e+00> : vector<8x80xf32>
    %106 = tpu.matmul %105, %103, %cst_65 {dimension_numbers = #tpu.dot_dimension_numbers<[1], [0], [0], [1], [0, 0, 1, 1], [], []>} : vector<8x4xbf16>, vector<4x80xbf16>, vector<8x80xf32> -> vector<8x80xf32>
    %107 = arith.addf %98, %106 : vector<8x80xf32>
    %108 = vector.extract_strided_slice %102 {offsets = [0, 1], sizes = [4, 80], strides = [1, 1]} : vector<4x128xbf16> to vector<4x80xbf16>
    %c19 = arith.constant 19 : index
    %c0_66 = arith.constant 0 : index
    %c0_67 = arith.constant 0 : index
    %109 = vector.load %arg3[%c19, %c0_66, %c0_67] : memref<27x8x4xbf16, #tpu.memory_space<vmem>>, vector<1x8x4xbf16>
    %110 = vector.shape_cast %109 : vector<1x8x4xbf16> to vector<8x4xbf16>
    %cst_68 = arith.constant dense<0.000000e+00> : vector<8x80xf32>
    %111 = tpu.matmul %110, %108, %cst_68 {dimension_numbers = #tpu.dot_dimension_numbers<[1], [0], [0], [1], [0, 0, 1, 1], [], []>} : vector<8x4xbf16>, vector<4x80xbf16>, vector<8x80xf32> -> vector<8x80xf32>
    %112 = arith.addf %107, %111 : vector<8x80xf32>
    %113 = vector.extract_strided_slice %102 {offsets = [0, 2], sizes = [4, 80], strides = [1, 1]} : vector<4x128xbf16> to vector<4x80xbf16>
    %c20 = arith.constant 20 : index
    %c0_69 = arith.constant 0 : index
    %c0_70 = arith.constant 0 : index
    %114 = vector.load %arg3[%c20, %c0_69, %c0_70] : memref<27x8x4xbf16, #tpu.memory_space<vmem>>, vector<1x8x4xbf16>
    %115 = vector.shape_cast %114 : vector<1x8x4xbf16> to vector<8x4xbf16>
    %cst_71 = arith.constant dense<0.000000e+00> : vector<8x80xf32>
    %116 = tpu.matmul %115, %113, %cst_71 {dimension_numbers = #tpu.dot_dimension_numbers<[1], [0], [0], [1], [0, 0, 1, 1], [], []>} : vector<8x4xbf16>, vector<4x80xbf16>, vector<8x80xf32> -> vector<8x80xf32>
    %117 = arith.addf %112, %116 : vector<8x80xf32>
    %118 = vector.extract_strided_slice %102 {offsets = [0, 10], sizes = [4, 80], strides = [1, 1]} : vector<4x128xbf16> to vector<4x80xbf16>
    %c21 = arith.constant 21 : index
    %c0_72 = arith.constant 0 : index
    %c0_73 = arith.constant 0 : index
    %119 = vector.load %arg3[%c21, %c0_72, %c0_73] : memref<27x8x4xbf16, #tpu.memory_space<vmem>>, vector<1x8x4xbf16>
    %120 = vector.shape_cast %119 : vector<1x8x4xbf16> to vector<8x4xbf16>
    %cst_74 = arith.constant dense<0.000000e+00> : vector<8x80xf32>
    %121 = tpu.matmul %120, %118, %cst_74 {dimension_numbers = #tpu.dot_dimension_numbers<[1], [0], [0], [1], [0, 0, 1, 1], [], []>} : vector<8x4xbf16>, vector<4x80xbf16>, vector<8x80xf32> -> vector<8x80xf32>
    %122 = arith.addf %117, %121 : vector<8x80xf32>
    %123 = vector.extract_strided_slice %102 {offsets = [0, 11], sizes = [4, 80], strides = [1, 1]} : vector<4x128xbf16> to vector<4x80xbf16>
    %c22 = arith.constant 22 : index
    %c0_75 = arith.constant 0 : index
    %c0_76 = arith.constant 0 : index
    %124 = vector.load %arg3[%c22, %c0_75, %c0_76] : memref<27x8x4xbf16, #tpu.memory_space<vmem>>, vector<1x8x4xbf16>
    %125 = vector.shape_cast %124 : vector<1x8x4xbf16> to vector<8x4xbf16>
    %cst_77 = arith.constant dense<0.000000e+00> : vector<8x80xf32>
    %126 = tpu.matmul %125, %123, %cst_77 {dimension_numbers = #tpu.dot_dimension_numbers<[1], [0], [0], [1], [0, 0, 1, 1], [], []>} : vector<8x4xbf16>, vector<4x80xbf16>, vector<8x80xf32> -> vector<8x80xf32>
    %127 = arith.addf %122, %126 : vector<8x80xf32>
    %128 = vector.extract_strided_slice %102 {offsets = [0, 12], sizes = [4, 80], strides = [1, 1]} : vector<4x128xbf16> to vector<4x80xbf16>
    %c23 = arith.constant 23 : index
    %c0_78 = arith.constant 0 : index
    %c0_79 = arith.constant 0 : index
    %129 = vector.load %arg3[%c23, %c0_78, %c0_79] : memref<27x8x4xbf16, #tpu.memory_space<vmem>>, vector<1x8x4xbf16>
    %130 = vector.shape_cast %129 : vector<1x8x4xbf16> to vector<8x4xbf16>
    %cst_80 = arith.constant dense<0.000000e+00> : vector<8x80xf32>
    %131 = tpu.matmul %130, %128, %cst_80 {dimension_numbers = #tpu.dot_dimension_numbers<[1], [0], [0], [1], [0, 0, 1, 1], [], []>} : vector<8x4xbf16>, vector<4x80xbf16>, vector<8x80xf32> -> vector<8x80xf32>
    %132 = arith.addf %127, %131 : vector<8x80xf32>
    %133 = vector.extract_strided_slice %102 {offsets = [0, 20], sizes = [4, 80], strides = [1, 1]} : vector<4x128xbf16> to vector<4x80xbf16>
    %c24 = arith.constant 24 : index
    %c0_81 = arith.constant 0 : index
    %c0_82 = arith.constant 0 : index
    %134 = vector.load %arg3[%c24, %c0_81, %c0_82] : memref<27x8x4xbf16, #tpu.memory_space<vmem>>, vector<1x8x4xbf16>
    %135 = vector.shape_cast %134 : vector<1x8x4xbf16> to vector<8x4xbf16>
    %cst_83 = arith.constant dense<0.000000e+00> : vector<8x80xf32>
    %136 = tpu.matmul %135, %133, %cst_83 {dimension_numbers = #tpu.dot_dimension_numbers<[1], [0], [0], [1], [0, 0, 1, 1], [], []>} : vector<8x4xbf16>, vector<4x80xbf16>, vector<8x80xf32> -> vector<8x80xf32>
    %137 = arith.addf %132, %136 : vector<8x80xf32>
    %138 = vector.extract_strided_slice %102 {offsets = [0, 21], sizes = [4, 80], strides = [1, 1]} : vector<4x128xbf16> to vector<4x80xbf16>
    %c25 = arith.constant 25 : index
    %c0_84 = arith.constant 0 : index
    %c0_85 = arith.constant 0 : index
    %139 = vector.load %arg3[%c25, %c0_84, %c0_85] : memref<27x8x4xbf16, #tpu.memory_space<vmem>>, vector<1x8x4xbf16>
    %140 = vector.shape_cast %139 : vector<1x8x4xbf16> to vector<8x4xbf16>
    %cst_86 = arith.constant dense<0.000000e+00> : vector<8x80xf32>
    %141 = tpu.matmul %140, %138, %cst_86 {dimension_numbers = #tpu.dot_dimension_numbers<[1], [0], [0], [1], [0, 0, 1, 1], [], []>} : vector<8x4xbf16>, vector<4x80xbf16>, vector<8x80xf32> -> vector<8x80xf32>
    %142 = arith.addf %137, %141 : vector<8x80xf32>
    %143 = vector.extract_strided_slice %102 {offsets = [0, 22], sizes = [4, 80], strides = [1, 1]} : vector<4x128xbf16> to vector<4x80xbf16>
    %c26 = arith.constant 26 : index
    %c0_87 = arith.constant 0 : index
    %c0_88 = arith.constant 0 : index
    %144 = vector.load %arg3[%c26, %c0_87, %c0_88] : memref<27x8x4xbf16, #tpu.memory_space<vmem>>, vector<1x8x4xbf16>
    %145 = vector.shape_cast %144 : vector<1x8x4xbf16> to vector<8x4xbf16>
    %cst_89 = arith.constant dense<0.000000e+00> : vector<8x80xf32>
    %146 = tpu.matmul %145, %143, %cst_89 {dimension_numbers = #tpu.dot_dimension_numbers<[1], [0], [0], [1], [0, 0, 1, 1], [], []>} : vector<8x4xbf16>, vector<4x80xbf16>, vector<8x80xf32> -> vector<8x80xf32>
    %147 = arith.addf %142, %146 : vector<8x80xf32>
    %c0_90 = arith.constant 0 : index
    %c0_91 = arith.constant 0 : index
    %c0_92 = arith.constant 0 : index
    %c0_93 = arith.constant 0 : index
    %148 = vector.load %arg5[%c0_90, %c0_91, %c0_92, %c0_93] : memref<1x1x8x80xf32, #tpu.memory_space<vmem>>, vector<1x1x8x80xf32>
    %149 = vector.shape_cast %148 : vector<1x1x8x80xf32> to vector<8x80xf32>
    %150 = vector.shape_cast %147 : vector<8x80xf32> to vector<1x1x8x80xf32>
    tpu.vector_store %arg5[%c0_90, %c0_91, %c0_92, %c0_93], %150 {strides = array<i32>} : memref<1x1x8x80xf32, #tpu.memory_space<vmem>>, vector<1x1x8x80xf32>,
    %c0_94 = arith.constant 0 : index
    %c0_95 = arith.constant 0 : index
    %151 = vector.load %arg4[%c0_94, %c0_95] : memref<1x80xf32, #tpu.memory_space<vmem>>, vector<1x80xf32>
    %152 = vector.broadcast %151 : vector<1x80xf32> to vector<8x80xf32>
    %153 = arith.mulf %147, %152 : vector<8x80xf32>
    %cst_96 = arith.constant dense<0.000000e+00> : vector<8xf32>
    %154 = vector.multi_reduction <add>, %153, %cst_96 [1] : vector<8x80xf32> to vector<8xf32>
    %155 = vector.shape_cast %154 : vector<8xf32> to vector<8x1xf32>
    %c0_97 = arith.constant 0 : index
    %c0_98 = arith.constant 0 : index
    %c0_99 = arith.constant 0 : index
    %c0_100 = arith.constant 0 : index
    %156 = vector.load %arg6[%c0_97, %c0_98, %c0_99, %c0_100] : memref<1x1x8x2xf32, #tpu.memory_space<vmem>>, vector<1x1x8x1xf32>
    %157 = vector.shape_cast %156 : vector<1x1x8x1xf32> to vector<8x1xf32>
    %158 = vector.shape_cast %155 : vector<8x1xf32> to vector<1x1x8x1xf32>
    tpu.vector_store %arg6[%c0_97, %c0_98, %c0_99, %c0_100], %158 {strides = array<i32>} : memref<1x1x8x2xf32, #tpu.memory_space<vmem>>, vector<1x1x8x1xf32>,
    %159 = arith.mulf %153, %147 : vector<8x80xf32>
    %cst_101 = arith.constant dense<0.000000e+00> : vector<8xf32>
    %160 = vector.multi_reduction <add>, %159, %cst_101 [1] : vector<8x80xf32> to vector<8xf32>
    %161 = vector.shape_cast %160 : vector<8xf32> to vector<8x1xf32>
    %c0_102 = arith.constant 0 : index
    %c0_103 = arith.constant 0 : index
    %c0_104 = arith.constant 0 : index
    %c1_105 = arith.constant 1 : index
    %162 = vector.load %arg6[%c0_102, %c0_103, %c0_104, %c1_105] : memref<1x1x8x2xf32, #tpu.memory_space<vmem>>, vector<1x1x8x1xf32>
    %163 = vector.shape_cast %162 : vector<1x1x8x1xf32> to vector<8x1xf32>
    %164 = vector.shape_cast %161 : vector<8x1xf32> to vector<1x1x8x1xf32>
    tpu.vector_store %arg6[%c0_102, %c0_103, %c0_104, %c1_105], %164 {strides = array<i32>} : memref<1x1x8x2xf32, #tpu.memory_space<vmem>>, vector<1x1x8x1xf32>,
    return
  }
  func.func @transform_0(%arg0: i32, %arg1: i32) -> (i32, i32, i32, i32) {
    %c0_i32 = arith.constant 0 : i32
    %c0_i32_0 = arith.constant 0 : i32
    %c0_i32_1 = arith.constant 0 : i32
    %c0_i32_2 = arith.constant 0 : i32
    return %arg0, %c0_i32, %c0_i32_0, %c0_i32_1 : i32, i32, i32, i32
  }
  func.func @transform_1(%arg0: i32, %arg1: i32) -> (i32, i32, i32) {
    %c0_i32 = arith.constant 0 : i32
    %c0_i32_0 = arith.constant 0 : i32
    %c0_i32_1 = arith.constant 0 : i32
    %c0_i32_2 = arith.constant 0 : i32
    return %c0_i32, %c0_i32_0, %c0_i32_1 : i32, i32, i32
  }
  func.func @transform_2(%arg0: i32, %arg1: i32) -> (i32, i32) {
    %c0_i32 = arith.constant 0 : i32
    %c0_i32_0 = arith.constant 0 : i32
    %c0_i32_1 = arith.constant 0 : i32
    return %c0_i32, %c0_i32_0 : i32, i32
  }
  func.func @transform_3(%arg0: i32, %arg1: i32) -> (i32, i32, i32, i32) {
    %c0_i32 = arith.constant 0 : i32
    %c0_i32_0 = arith.constant 0 : i32
    %c0_i32_1 = arith.constant 0 : i32
    return %arg0, %arg1, %c0_i32, %c0_i32_0 : i32, i32, i32, i32
  }
  func.func @transform_4(%arg0: i32, %arg1: i32) -> (i32, i32, i32, i32) {
    %c0_i32 = arith.constant 0 : i32
    %c0_i32_0 = arith.constant 0 : i32
    %c0_i32_1 = arith.constant 0 : i32
    return %arg0, %arg1, %c0_i32, %c0_i32_0 : i32, i32, i32, i32
  }
}

module attributes {stable_mosaic.version = 11 : i64} {
  func.func @_bn_lrelu_kernel(%arg0: i32, %arg1: i32, %arg2: memref<1x1x8x80xf32, #tpu.memory_space<vmem>>, %arg3: memref<8x1xf32, #tpu.memory_space<vmem>>, %arg4: memref<8x1xf32, #tpu.memory_space<vmem>>, %arg5: memref<1x1x8x80xf32, #tpu.memory_space<vmem>>) attributes {dimension_semantics = [#tpu.dimension_semantics<parallel>, #tpu.dimension_semantics<parallel>], iteration_bounds = array<i64: 2, 8>, scalar_prefetch = 0 : i64, scratch_operands = 0 : i64, tpu.core_type = #tpu.core_type<tc>, window_params = [{transform_indices = @transform_0, window_bounds = array<i64: 1, 1, 8, 80>}, {pipeline_mode = #tpu.pipeline_mode<synchronous>, transform_indices = @transform_1, window_bounds = array<i64: 8, 1>}, {pipeline_mode = #tpu.pipeline_mode<synchronous>, transform_indices = @transform_2, window_bounds = array<i64: 8, 1>}, {transform_indices = @transform_3, window_bounds = array<i64: 1, 1, 8, 80>}]} {
    %c0 = arith.constant 0 : index
    %c0_0 = arith.constant 0 : index
    %c0_1 = arith.constant 0 : index
    %c0_2 = arith.constant 0 : index
    %0 = vector.load %arg2[%c0, %c0_0, %c0_1, %c0_2] : memref<1x1x8x80xf32, #tpu.memory_space<vmem>>, vector<1x1x8x80xf32>
    %1 = vector.shape_cast %0 : vector<1x1x8x80xf32> to vector<8x80xf32>
    %c0_3 = arith.constant 0 : index
    %c0_4 = arith.constant 0 : index
    %2 = vector.load %arg3[%c0_3, %c0_4] : memref<8x1xf32, #tpu.memory_space<vmem>>, vector<8x1xf32>
    %3 = vector.broadcast %2 : vector<8x1xf32> to vector<8x80xf32>
    %4 = arith.mulf %1, %3 : vector<8x80xf32>
    %c0_5 = arith.constant 0 : index
    %c0_6 = arith.constant 0 : index
    %5 = vector.load %arg4[%c0_5, %c0_6] : memref<8x1xf32, #tpu.memory_space<vmem>>, vector<8x1xf32>
    %6 = vector.broadcast %5 : vector<8x1xf32> to vector<8x80xf32>
    %7 = arith.addf %4, %6 : vector<8x80xf32>
    %cst = arith.constant 0.000000e+00 : f32
    %8 = vector.broadcast %cst : f32 to vector<8x80xf32>
    %9 = arith.cmpf ogt, %7, %8 : vector<8x80xf32>
    %cst_7 = arith.constant 2.000000e-01 : f32
    %10 = vector.broadcast %cst_7 : f32 to vector<8x80xf32>
    %11 = arith.mulf %10, %7 : vector<8x80xf32>
    %12 = arith.select %9, %7, %11 : vector<8x80xi1>, vector<8x80xf32>
    %c0_8 = arith.constant 0 : index
    %c0_9 = arith.constant 0 : index
    %c0_10 = arith.constant 0 : index
    %c0_11 = arith.constant 0 : index
    %13 = vector.load %arg5[%c0_8, %c0_9, %c0_10, %c0_11] : memref<1x1x8x80xf32, #tpu.memory_space<vmem>>, vector<1x1x8x80xf32>
    %14 = vector.shape_cast %13 : vector<1x1x8x80xf32> to vector<8x80xf32>
    %15 = vector.shape_cast %12 : vector<8x80xf32> to vector<1x1x8x80xf32>
    tpu.vector_store %arg5[%c0_8, %c0_9, %c0_10, %c0_11], %15 {strides = array<i32>} : memref<1x1x8x80xf32, #tpu.memory_space<vmem>>, vector<1x1x8x80xf32>,
    return
  }
  func.func @transform_0(%arg0: i32, %arg1: i32) -> (i32, i32, i32, i32) {
    %c0_i32 = arith.constant 0 : i32
    %c0_i32_0 = arith.constant 0 : i32
    %c0_i32_1 = arith.constant 0 : i32
    return %arg0, %arg1, %c0_i32, %c0_i32_0 : i32, i32, i32, i32
  }
  func.func @transform_1(%arg0: i32, %arg1: i32) -> (i32, i32) {
    %c0_i32 = arith.constant 0 : i32
    %c0_i32_0 = arith.constant 0 : i32
    %c0_i32_1 = arith.constant 0 : i32
    return %c0_i32, %c0_i32_0 : i32, i32
  }
  func.func @transform_2(%arg0: i32, %arg1: i32) -> (i32, i32) {
    %c0_i32 = arith.constant 0 : i32
    %c0_i32_0 = arith.constant 0 : i32
    %c0_i32_1 = arith.constant 0 : i32
    return %c0_i32, %c0_i32_0 : i32, i32
  }
  func.func @transform_3(%arg0: i32, %arg1: i32) -> (i32, i32, i32, i32) {
    %c0_i32 = arith.constant 0 : i32
    %c0_i32_0 = arith.constant 0 : i32
    %c0_i32_1 = arith.constant 0 : i32
    return %arg0, %arg1, %c0_i32, %c0_i32_0 : i32, i32, i32, i32
  }
}

</mosaic_0001>

<bundles_post_ra>
// kernel: conv_block_3d_pallas.3
= control target key start
LH: loop header
LB: loop body
LE: loop exit
PB: predicated region body
PF: predicated region fallthrough
CT: control target
= control target key end

     0   :  { %s422_s12 = smov 0   ;;  %s424_s13 = smov 0   ;;  %s479_s0 = inlined_call_operand.vmem [shape: f32[2,8,8,80], index: 0, kind: input, shape index: {}]   ;;  %s480_s1 = inlined_call_operand.vmem [shape: f32[8,1], index: 1, kind: input, shape index: {}]   ;;  %s481_s2 = inlined_call_operand.vmem [shape: f32[8,1], index: 2, kind: input, shape index: {}]   ;;  %s482_s3 = inlined_call_operand.vmem [shape: f32[2,8,8,80], index: 3, kind: output, shape index: {}]  }
   0x1   :  { %s426_s14 = smov 0   ;;  %s428_s15 = smov 0  }
   0x2   :  { %s430_s16 = smov 0  }
   0x3 LB: > { %s22_s17 = sadd.s32 1, %s391_s14  ;;  %s25_s18 = sadd.s32 1, %s395_s15  ;;  %s399_s16 = sphi %s430_s16, %s13_s16   ;;  %s395_s15 = sphi %s428_s15, %s486_s15   ;;  %s391_s14 = sphi %s426_s14, %s485_s14   ;;  %s387_s13 = sphi %s424_s13, %s484_s13   ;;  %s383_s12 = sphi %s422_s12, %s483_s12  }
   0x4   : > { %p23_p0 = scmp.ge.s32.totalorder %s22_s17, 8  ;;  %p312_p1 = scmp.ge.s32.totalorder %s399_s16, 1 }
   0x5   : > { %p156_p2 = scmp.lt.s32.totalorder %s399_s16, 17 }
   0x6   : > { %s488_s17 = smov (%p23_p0, %s22_s17), 0  ;;  %s490_s18 = smov (!%p23_p0, %s25_s18), %s395_s15 }
   0x7   : > { %p157_p3 = pnand %p312_p1, %p156_p2  ;;  %p27_p4 = scmp.ge.s32.totalorder %s490_s18, 2 }
   0x8   : > { %p186_p5 = scmp.lt.s32.totalorder (!%p157_p3), %s387_s13, 1  ;;  %p188_p6 = scmp.lt.s32.totalorder (!%p157_p3), %s383_s12, 7 }
   0x9   : > { %s492_s18 = smov (%p27_p4, %s490_s18), 0  ;;  %160 = sbr.rel (%p157_p3) target bundleno = 150 (0x96), region = 32 }
   0xe   : > { %v203_v0 = vld [vmem:[%s480_s1] sm:$0xff]  ;;  %v401_v1 = vmov 0   ;;  %s494_s13 = smov (!%p186_p5, %s387_s13), 1  ;;  %s496_s12 = smov (!%p188_p6, %s383_s12), 7  ;;  %vm220_vm0 = vcmask 654336  }
   0xf   : > { %360 = vset.pattern.permute.xlu0 %v401_v1  ;;  %v210_v2 = vld [vmem:[%s481_s2] sm:$0xff]  ;;  %s313_s23 = sshll.u32 %s494_s13, 3 }
  0x10   : > { %206 = vperm.xlu0 %360, %v203_v0   ;;  %s191_s24 = sadd.s32 %s313_s23, %s496_s12 }
  0x11   : > { %s314_s25 = sshll.u32 %s191_s24, 3 }
  0x12   : > { %s193_s28 = scalar_lea.vmem %s479_s0, %s314_s25  ;;  %s201_s4 = scalar_lea.vmem %s482_s3, %s314_s25 }
  0x13   : > { %v202_v4 = vld [vmem:[%s193_s28] sm:$0xff] }
  0x14   : > { %213 = vperm.xlu0 %360, %v210_v2  }
  0x8b   : > { %v207_v3 = vpop.permute.xlu0 %206 }
  0x8c   : > { %v209_v5 = vmul.f32 %v207_v3, %v202_v4 }
  0x8f   : > { %v214_v6 = vpop.permute.xlu0 %213 }
  0x90   : > { %v216_v7 = vadd.f32 %v214_v6, %v209_v5 }
  0x92   : > { %vm217_vm1 = vcmp.gt.f32.partialorder %v216_v7, 0.0  ;;  %v218_v8 = vmul.f32 0.2, %v216_v7 }
  0x94   : > { %v219_v9 = vsel %vm217_vm1, %v216_v7, %v218_v8 }
  0x95   : > { %221 = vst.msk [vmem:[%s201_s4] sm:$0xff] %vm220_vm0, %v219_v9 }
  0x96 PF: > { %s13_s16 = sadd.s32 1, %s399_s16   ;;  %s483_s12 = smov %s391_s14 }
  0x97   : > { %p10_p7 = scmp.ge.s32.totalorder %s13_s16, 18   ;;  %s484_s13 = smov %s395_s15 }
  0x98   : > { %s485_s14 = smov %s488_s17  ;;  %s486_s15 = smov %s492_s18 }
  0x99   :  { %12 = sbr.rel (!%p10_p7) target bundleno = 3 (0x3), region = 62 }

// kernel: conv_block_3d_pallas.2
= control target key start
LH: loop header
LB: loop body
LE: loop exit
PB: predicated region body
PF: predicated region fallthrough
CT: control target
= control target key end

     0   :  { %s2216_s15 = smov 0   ;;  %s2218_s16 = smov 0   ;;  %s2520_s0 = inlined_call_operand.vmem [shape: bf16[2,10,4,128], index: 0, kind: input, shape index: {}]   ;;  %s2521_s1 = inlined_call_operand.vmem [shape: bf16[27,8,4], index: 1, kind: input, shape index: {}]   ;;  %s2522_s2 = inlined_call_operand.vmem [shape: f32[1,80], index: 2, kind: input, shape index: {}]   ;;  %s2523_s3 = inlined_call_operand.vmem [shape: f32[2,8,8,80], index: 3, kind: output, shape index: {0}]   ;;  %s2524_s4 = inlined_call_operand.vmem [shape: f32[2,8,8,2], index: 4, kind: output, shape index: {1}]  }
   0x1   :  { %s2220_s17 = smov 0   ;;  %s2222_s18 = smov 0  }
   0x2   :  { %s2224_s19 = smov 0  }
   0x3 LB: > { %s24_s20 = sadd.s32 1, %s2170_s17  ;;  %s27_s21 = sadd.s32 1, %s2174_s18  ;;  %s2178_s19 = sphi %s2224_s19, %s15_s19   ;;  %s2174_s18 = sphi %s2222_s18, %s2528_s18   ;;  %s2170_s17 = sphi %s2220_s17, %s2527_s17   ;;  %s2166_s16 = sphi %s2218_s16, %s2526_s16   ;;  %s2162_s15 = sphi %s2216_s15, %s2525_s15  }
   0x4   : > { %p25_p0 = scmp.ge.s32.totalorder %s24_s20, 8  ;;  %p1805_p1 = scmp.ge.s32.totalorder %s2178_s19, 1 }
   0x5   : > { %p181_p2 = scmp.lt.s32.totalorder %s2178_s19, 17 }
   0x6   : > { %s2530_s20 = smov (%p25_p0, %s24_s20), 0  ;;  %s2532_s21 = smov (!%p25_p0, %s27_s21), %s2174_s18 }
   0x7   : > { %p182_p3 = pnand %p1805_p1, %p181_p2  ;;  %p29_p4 = scmp.ge.s32.totalorder %s2532_s21, 2 }
   0x8   : > { %p218_p5 = scmp.lt.s32.totalorder (!%p182_p3), %s2166_s16, 1  ;;  %s1811_s23 = sshll.u32 (!%p182_p3), %s2162_s15, 1 }
   0x9   : > { %s2534_s21 = smov (%p29_p4, %s2532_s21), 0  ;;  %185 = sbr.rel (%p182_p3) target bundleno = 585 (0x249), region = 32 }
   0xa   : > { %s2183_s30 = smov (!%p182_p3), 127   ;;  %s2184_s5 = smov (!%p182_p3), 118  }
   0xb   : > { %s2185_s6 = smov (!%p182_p3), 126   ;;  %s2186_s7 = smov (!%p182_p3), 117  }
   0xc   : > { %s2187_s8 = smov (!%p182_p3), 116   ;;  %s2188_s9 = smov (!%p182_p3), 108  }
   0xd   : > { %s2189_s10 = smov (!%p182_p3), 107   ;;  %s2190_s11 = smov (!%p182_p3), 106  }
   0xe   : > { %v250_v0 = vlaneseq  ;;  %v2180_v1 = vmov 1983009808   ;;  %v2181_v3 = vmov 0.0   ;;  %s2536_s16 = smov (!%p218_p5, %s2166_s16), 1  ;;  %vm2182_vm0 = vmmov 0   ;;  %p225_p6 = scmp.lt.s32.totalorder %s2162_s15, 7 }
   0xf   : > { %v248_v2 = vunpack.c.l.s4 %v2180_v1  ;;  %1926 = vmatprep.subr.bf16.mxu0 %v2181_v3  ;;  %1932 = vmatprep.subr.bf16.mxu1 %v2181_v3  ;;  %s2088_s22 = smul.u32 20, %s2536_s16  ;;  %vm260_vm1 = vcmask 1041408   ;;  %vm256_vm2 = vcmask 31744   ;;  %v243_v10 = vld [vmem:[%s2521_s1] sm:$0xf]  ;;  %vm1645_vm3 = vcmask 654336  }
  0x10   : > { %v251_v4 = vshrl.u32 %v250_v0, 7  ;;  %1928 = vmatprep.mubr.msk.bf16.mxu0 %vm2182_vm0, %v2181_v3  ;;  %1934 = vmatprep.mubr.msk.bf16.mxu1 %vm2182_vm0, %v2181_v3  ;;  %v1812_v19 = vld [vmem:[%s2521_s1 + $0x4] sm:$0xf]  ;;  %v1817_v20 = vld [vmem:[%s2521_s1 + $0xc] sm:$0xf]  ;;  %s2538_s15 = smov (!%p225_p6, %s2162_s15), 7 }
  0x11   : > { %v249_v5 = vunpack.c.0.s8 %v248_v2  ;;  %s222_s26 = scalar_lea.vmem %s2520_s0, %s2088_s22  ;;  %v1815_v26 = vld [vmem:[%s2521_s1 + $0x8] sm:$0xf]  ;;  %v1821_v27 = vld [vmem:[%s2521_s1 + $0x14] sm:$0xf]  ;;  %v1819_v32 = vld [vmem:[%s2521_s1 + $0x10] sm:$0xf] }
  0x12   : > { %s2261_s27 = scalar_lea.vmem %s222_s26, %s1811_s23  ;;  %v1825_v33 = vld [vmem:[%s2521_s1 + $0x1c] sm:$0xf]  ;;  %v1823_v38 = vld [vmem:[%s2521_s1 + $0x18] sm:$0xf]  ;;  %v1831_v39 = vld [vmem:[%s2521_s1 + $0x24] sm:$0xf] }
  0x13   : > { %v252_v6 = vsub.s32 %v249_v5, %v251_v4  ;;  %v242_v7 = vld [vmem:[%s2261_s27] sm:$0x3]  ;;  %v2275_v11 = vld [vmem:[%s2261_s27 + $0x2] sm:$0x3]  ;;  %v2281_v13 = vld [vmem:[%s2261_s27 + $0x4] sm:$0x3] }
  0x14   : > { %v308_v9 = vsel %vm260_vm1, %v242_v7, 0  ;;  %v717_v35 = vsel %vm260_vm1, %v2275_v11, 0  ;;  %v1827_v44 = vld [vmem:[%s2521_s1 + $0x20] sm:$0xf]  ;;  %v1835_v45 = vld [vmem:[%s2521_s1 + $0x2c] sm:$0xf] }
  0x15   : > { %v253_v8 = vrot.slane %v242_v7, %v252_v6  ;;  %1933 = vmatpush3.bf16.msra.mxu1 %v308_v9  ;;  %v769_v12 = vrot.slane %v2275_v11, %v252_v6  ;;  %v1238_v14 = vrot.slane %v2281_v13, %v252_v6  ;;  %v1833_v50 = vld [vmem:[%s2521_s1 + $0x28] sm:$0xf]  ;;  %v1839_v51 = vld [vmem:[%s2521_s1 + $0x34] sm:$0xf]  ;;  %v1837_v56 = vld [vmem:[%s2521_s1 + $0x30] sm:$0xf] }
  0x16   : > { %1944 = vmatprep.subr.bf16.mxu1 %v2181_v3  ;;  %v1843_v57 = vld [vmem:[%s2521_s1 + $0x3c] sm:$0xf]  ;;  %v1841_v62 = vld [vmem:[%s2521_s1 + $0x38] sm:$0xf]  ;;  %v1847_v63 = vld [vmem:[%s2521_s1 + $0x44] sm:$0xf] }
  0x17   : > { %254 = vrot.lane.b32.xlu0 %v253_v8, %s2183_s30  ;;  %403 = vrot.lane.b32.xlu1 %v253_v8, %s2184_s5  ;;  %v1845_v4 = vld [vmem:[%s2521_s1 + $0x40] sm:$0xf]  ;;  %v1853_v5 = vld [vmem:[%s2521_s1 + $0x4c] sm:$0xf]  ;;  %v1186_v6 = vsel %vm260_vm1, %v2281_v13, 0  ;;  %vm1658_vm4 = vcmask 7168  }
  0x18   : > { %1935 = vmatmul.mubr.msk.bf16.vlgmr.msra.gmra.mxu1 %vm256_vm2, %v243_v10  ;;  %v1851_v10 = vld [vmem:[%s2521_s1 + $0x48] sm:$0xf]  ;;  %v1857_v11 = vld [vmem:[%s2521_s1 + $0x54] sm:$0xf]  ;;  %vm1664_vm5 = vcmask 15368  }
  0x19   : > { %1946 = vmatprep.mubr.msk.bf16.mxu1 %vm2182_vm0, %v2181_v3 }
  0x1b   : > { %352 = vrot.lane.b32.xlu0 %v253_v8, %s2185_s6  ;;  %454 = vrot.lane.b32.xlu1 %v253_v8, %s2186_s7 }
  0x1f   : > { %505 = vrot.lane.b32.xlu0 %v253_v8, %s2187_s8  ;;  %556 = vrot.lane.b32.xlu1 %v253_v8, %s2188_s9 }
  0x23   : > { %607 = vrot.lane.b32.xlu0 %v253_v8, %s2189_s10  ;;  %658 = vrot.lane.b32.xlu1 %v253_v8, %s2190_s11 }
  0x27   : > { %770 = vrot.lane.b32.xlu0 %v769_v12, %s2183_s30  ;;  %821 = vrot.lane.b32.xlu1 %v769_v12, %s2185_s6 }
  0x2b   : > { %872 = vrot.lane.b32.xlu0 %v769_v12, %s2184_s5  ;;  %923 = vrot.lane.b32.xlu1 %v769_v12, %s2186_s7 }
  0x2f   : > { %974 = vrot.lane.b32.xlu0 %v769_v12, %s2187_s8  ;;  %1025 = vrot.lane.b32.xlu1 %v769_v12, %s2188_s9 }
  0x33   : > { %1076 = vrot.lane.b32.xlu0 %v769_v12, %s2189_s10  ;;  %1127 = vrot.lane.b32.xlu1 %v769_v12, %s2190_s11 }
  0x37   : > { %1239 = vrot.lane.b32.xlu0 %v1238_v14, %s2183_s30  ;;  %1290 = vrot.lane.b32.xlu1 %v1238_v14, %s2185_s6 }
  0x3b   : > { %1341 = vrot.lane.b32.xlu0 %v1238_v14, %s2184_s5  ;;  %1392 = vrot.lane.b32.xlu1 %v1238_v14, %s2186_s7  ;;  %s1807_s7 = sshll.u32 %s2536_s16, 3 }
  0x3f   : > { %1443 = vrot.lane.b32.xlu0 %v1238_v14, %s2187_s8  ;;  %1494 = vrot.lane.b32.xlu1 %v1238_v14, %s2188_s9  ;;  %s228_s8 = sadd.s32 %s1807_s7, %s2538_s15 }
  0x40   : > { %s1808_s9 = sshll.u32 %s228_s8, 3 }
  0x41   : > { %s230_s12 = scalar_lea.vmem %s2523_s3, %s1808_s9  ;;  %s238_s22 = scalar_lea.vmem %s2524_s4, %s1808_s9 }
  0x43   : > { %1545 = vrot.lane.b32.xlu0 %v1238_v14, %s2189_s10  ;;  %1596 = vrot.lane.b32.xlu1 %v1238_v14, %s2190_s11 }
  0x89   : > { %v255_v15 = vpop.permute.xlu0 %254  ;;  %v404_v16 = vpop.permute.xlu1 %403 }
  0x8a   : > { %v262_v17 = vsel %vm260_vm1, %v255_v15, 0  ;;  %v409_v18 = vsel %vm260_vm1, %v404_v16, 0 }
  0x8b   : > { %1927 = vmatpush3.bf16.msra.mxu0 %v262_v17  ;;  %1945 = vmatpush3.bf16.msra.mxu1 %v409_v18  ;;  %v1855_v17 = vld [vmem:[%s2521_s1 + $0x50] sm:$0xf]  ;;  %v1861_v18 = vld [vmem:[%s2521_s1 + $0x5c] sm:$0xf] }
  0x8c   : > { %1938 = vmatprep.subr.bf16.mxu0 %v2181_v3  ;;  %1956 = vmatprep.subr.bf16.mxu1 %v2181_v3 }
  0x8d   : > { %v353_v21 = vpop.permute.xlu0 %352  ;;  %v455_v23 = vpop.permute.xlu1 %454 }
  0x8e   : > { %v358_v22 = vsel %vm260_vm1, %v353_v21, 0  ;;  %1929 = vmatmul.mubr.msk.bf16.vlgmr.msra.gmra.mxu0 %vm256_vm2, %v1812_v19  ;;  %1947 = vmatmul.mubr.msk.bf16.vlgmr.msra.gmra.mxu1 %vm256_vm2, %v1817_v20  ;;  %v460_v28 = vsel %vm260_vm1, %v455_v23, 0 }
  0x8f   : > { %1939 = vmatpush3.bf16.msra.mxu0 %v358_v22  ;;  %1940 = vmatprep.mubr.msk.bf16.mxu0 %vm2182_vm0, %v2181_v3 }
  0x90   : > { %1950 = vmatprep.subr.bf16.mxu0 %v2181_v3  ;;  %1958 = vmatprep.mubr.msk.bf16.mxu1 %vm2182_vm0, %v2181_v3 }
  0x91   : > { %v506_v24 = vpop.permute.xlu0 %505  ;;  %v557_v31 = vpop.permute.xlu1 %556 }
  0x92   : > { %v511_v25 = vsel %vm260_vm1, %v506_v24, 0  ;;  %v562_v34 = vsel %vm260_vm1, %v557_v31, 0  ;;  %v1867_v31 = vld [vmem:[%s2521_s1 + $0x68] sm:$0xf] }
  0x93   : > { %1957 = vmatpush3.bf16.msra.mxu1 %v511_v25  ;;  %v1859_v25 = vld [vmem:[%s2521_s1 + $0x58] sm:$0xf] }
  0x94   : > { %1968 = vmatprep.subr.bf16.mxu1 %v2181_v3 }
  0x95   : > { %v608_v29 = vpop.permute.xlu0 %607  ;;  %v659_v36 = vpop.permute.xlu1 %658 }
  0x96   : > { %1941 = vmatmul.mubr.msk.bf16.vlgmr.msra.gmra.mxu0 %vm256_vm2, %v1815_v26  ;;  %1959 = vmatmul.mubr.msk.bf16.vlgmr.msra.gmra.mxu1 %vm256_vm2, %v1821_v27  ;;  %v613_v30 = vsel %vm260_vm1, %v608_v29, 0  ;;  %v664_v40 = vsel %vm260_vm1, %v659_v36, 0  ;;  %v1865_v26 = vld [vmem:[%s2521_s1 + $0x64] sm:$0xf]  ;;  %v1863_v29 = vld [vmem:[%s2521_s1 + $0x60] sm:$0xf] }
  0x97   : > { %1951 = vmatpush3.bf16.msra.mxu0 %v460_v28  ;;  %1952 = vmatprep.mubr.msk.bf16.mxu0 %vm2182_vm0, %v2181_v3 }
  0x98   : > { %1962 = vmatprep.subr.bf16.mxu0 %v2181_v3  ;;  %1969 = vmatpush3.bf16.msra.mxu1 %v613_v30 }
  0x99   : > { %1970 = vmatprep.mubr.msk.bf16.mxu1 %vm2182_vm0, %v2181_v3  ;;  %1980 = vmatprep.subr.bf16.mxu1 %v2181_v3  ;;  %v822_v37 = vpop.permute.xlu1 %821  ;;  %v771_v42 = vpop.permute.xlu0 %770 }
  0x9a   : > { %v827_v41 = vsel %vm260_vm1, %v822_v37, 0  ;;  %v776_v46 = vsel %vm260_vm1, %v771_v42, 0 }
  0x9d   : > { %v924_v43 = vpop.permute.xlu1 %923  ;;  %v873_v48 = vpop.permute.xlu0 %872 }
  0x9e   : > { %1953 = vmatmul.mubr.msk.bf16.vlgmr.msra.gmra.mxu0 %vm256_vm2, %v1819_v32  ;;  %1971 = vmatmul.mubr.msk.bf16.vlgmr.msra.gmra.mxu1 %vm256_vm2, %v1825_v33  ;;  %v929_v47 = vsel %vm260_vm1, %v924_v43, 0  ;;  %v878_v52 = vsel %vm260_vm1, %v873_v48, 0 }
  0x9f   : > { %1963 = vmatpush3.bf16.msra.mxu0 %v562_v34  ;;  %1964 = vmatprep.mubr.msk.bf16.mxu0 %vm2182_vm0, %v2181_v3 }
  0xa0   : > { %1974 = vmatprep.subr.bf16.mxu0 %v2181_v3  ;;  %1981 = vmatpush3.bf16.msra.mxu1 %v717_v35 }
  0xa1   : > { %1982 = vmatprep.mubr.msk.bf16.mxu1 %vm2182_vm0, %v2181_v3  ;;  %1992 = vmatprep.subr.bf16.mxu1 %v2181_v3  ;;  %v1026_v49 = vpop.permute.xlu1 %1025  ;;  %v975_v54 = vpop.permute.xlu0 %974 }
  0xa2   : > { %v1031_v53 = vsel %vm260_vm1, %v1026_v49, 0  ;;  %v980_v58 = vsel %vm260_vm1, %v975_v54, 0 }
  0xa5   : > { %v1128_v55 = vpop.permute.xlu1 %1127  ;;  %v1077_v60 = vpop.permute.xlu0 %1076 }
  0xa6   : > { %1965 = vmatmul.mubr.msk.bf16.vlgmr.msra.gmra.mxu0 %vm256_vm2, %v1823_v38  ;;  %1983 = vmatmul.mubr.msk.bf16.vlgmr.msra.gmra.mxu1 %vm256_vm2, %v1831_v39  ;;  %v1133_v59 = vsel %vm260_vm1, %v1128_v55, 0  ;;  %v1082_v0 = vsel %vm260_vm1, %v1077_v60, 0 }
  0xa7   : > { %1975 = vmatpush3.bf16.msra.mxu0 %v664_v40  ;;  %1976 = vmatprep.mubr.msk.bf16.mxu0 %vm2182_vm0, %v2181_v3 }
  0xa8   : > { %1986 = vmatprep.subr.bf16.mxu0 %v2181_v3  ;;  %1993 = vmatpush3.bf16.msra.mxu1 %v827_v41 }
  0xa9   : > { %1994 = vmatprep.mubr.msk.bf16.mxu1 %vm2182_vm0, %v2181_v3  ;;  %2004 = vmatprep.subr.bf16.mxu1 %v2181_v3  ;;  %v1240_v61 = vpop.permute.xlu0 %1239  ;;  %v1291_v8 = vpop.permute.xlu1 %1290 }
  0xaa   : > { %v1245_v1 = vsel %vm260_vm1, %v1240_v61, 0  ;;  %v1296_v12 = vsel %vm260_vm1, %v1291_v8, 0 }
  0xad   : > { %v1342_v2 = vpop.permute.xlu0 %1341  ;;  %v1393_v14 = vpop.permute.xlu1 %1392 }
  0xae   : > { %1977 = vmatmul.mubr.msk.bf16.vlgmr.msra.gmra.mxu0 %vm256_vm2, %v1827_v44  ;;  %1995 = vmatmul.mubr.msk.bf16.vlgmr.msra.gmra.mxu1 %vm256_vm2, %v1835_v45  ;;  %v1347_v7 = vsel %vm260_vm1, %v1342_v2, 0  ;;  %v1398_v20 = vsel %vm260_vm1, %v1393_v14, 0 }
  0xaf   : > { %1987 = vmatpush3.bf16.msra.mxu0 %v776_v46  ;;  %1988 = vmatprep.mubr.msk.bf16.mxu0 %vm2182_vm0, %v2181_v3 }
  0xb0   : > { %1998 = vmatprep.subr.bf16.mxu0 %v2181_v3  ;;  %2005 = vmatpush3.bf16.msra.mxu1 %v929_v47 }
  0xb1   : > { %2006 = vmatprep.mubr.msk.bf16.mxu1 %vm2182_vm0, %v2181_v3  ;;  %2016 = vmatprep.subr.bf16.mxu1 %v2181_v3  ;;  %v1444_v9 = vpop.permute.xlu0 %1443  ;;  %v1495_v24 = vpop.permute.xlu1 %1494 }
  0xb2   : > { %v1449_v13 = vsel %vm260_vm1, %v1444_v9, 0  ;;  %v1500_v27 = vsel %vm260_vm1, %v1495_v24, 0 }
  0xb5   : > { %v1546_v16 = vpop.permute.xlu0 %1545  ;;  %v1597_v28 = vpop.permute.xlu1 %1596 }
  0xb6   : > { %1989 = vmatmul.mubr.msk.bf16.vlgmr.msra.gmra.mxu0 %vm256_vm2, %v1833_v50  ;;  %2007 = vmatmul.mubr.msk.bf16.vlgmr.msra.gmra.mxu1 %vm256_vm2, %v1839_v51  ;;  %v1551_v21 = vsel %vm260_vm1, %v1546_v16, 0  ;;  %v1602_v30 = vsel %vm260_vm1, %v1597_v28, 0 }
  0xb7   : > { %1999 = vmatpush3.bf16.msra.mxu0 %v878_v52  ;;  %2000 = vmatprep.mubr.msk.bf16.mxu0 %vm2182_vm0, %v2181_v3 }
  0xb8   : > { %2010 = vmatprep.subr.bf16.mxu0 %v2181_v3  ;;  %2017 = vmatpush3.bf16.msra.mxu1 %v1031_v53 }
  0xb9   : > { %2018 = vmatprep.mubr.msk.bf16.mxu1 %vm2182_vm0, %v2181_v3  ;;  %2028 = vmatprep.subr.bf16.mxu1 %v2181_v3 }
  0xbe   : > { %2001 = vmatmul.mubr.msk.bf16.vlgmr.msra.gmra.mxu0 %vm256_vm2, %v1837_v56  ;;  %2019 = vmatmul.mubr.msk.bf16.vlgmr.msra.gmra.mxu1 %vm256_vm2, %v1843_v57 }
  0xbf   : > { %2011 = vmatpush3.bf16.msra.mxu0 %v980_v58  ;;  %2012 = vmatprep.mubr.msk.bf16.mxu0 %vm2182_vm0, %v2181_v3 }
  0xc0   : > { %2022 = vmatprep.subr.bf16.mxu0 %v2181_v3  ;;  %2029 = vmatpush3.bf16.msra.mxu1 %v1133_v59 }
  0xc1   : > { %2030 = vmatprep.mubr.msk.bf16.mxu1 %vm2182_vm0, %v2181_v3  ;;  %2040 = vmatprep.subr.bf16.mxu1 %v2181_v3 }
  0xc6   : > { %2013 = vmatmul.mubr.msk.bf16.vlgmr.msra.gmra.mxu0 %vm256_vm2, %v1841_v62  ;;  %2031 = vmatmul.mubr.msk.bf16.vlgmr.msra.gmra.mxu1 %vm256_vm2, %v1847_v63 }
  0xc7   : > { %2023 = vmatpush3.bf16.msra.mxu0 %v1082_v0  ;;  %2024 = vmatprep.mubr.msk.bf16.mxu0 %vm2182_vm0, %v2181_v3 }
  0xc8   : > { %2034 = vmatprep.subr.bf16.mxu0 %v2181_v3  ;;  %2041 = vmatpush3.bf16.msra.mxu1 %v1245_v1 }
  0xc9   : > { %2042 = vmatprep.mubr.msk.bf16.mxu1 %vm2182_vm0, %v2181_v3  ;;  %2052 = vmatprep.subr.bf16.mxu1 %v2181_v3 }
  0xce   : > { %2025 = vmatmul.mubr.msk.bf16.vlgmr.msra.gmra.mxu0 %vm256_vm2, %v1845_v4  ;;  %2043 = vmatmul.mubr.msk.bf16.vlgmr.msra.gmra.mxu1 %vm256_vm2, %v1853_v5 }
  0xcf   : > { %2035 = vmatpush3.bf16.msra.mxu0 %v1186_v6  ;;  %2036 = vmatprep.mubr.msk.bf16.mxu0 %vm2182_vm0, %v2181_v3 }
  0xd0   : > { %2046 = vmatprep.subr.bf16.mxu0 %v2181_v3  ;;  %2053 = vmatpush3.bf16.msra.mxu1 %v1347_v7 }
  0xd1   : > { %2054 = vmatprep.mubr.msk.bf16.mxu1 %vm2182_vm0, %v2181_v3  ;;  %2064 = vmatprep.subr.bf16.mxu1 %v2181_v3 }
  0xd6   : > { %2037 = vmatmul.mubr.msk.bf16.vlgmr.msra.gmra.mxu0 %vm256_vm2, %v1851_v10  ;;  %2055 = vmatmul.mubr.msk.bf16.vlgmr.msra.gmra.mxu1 %vm256_vm2, %v1857_v11 }
  0xd7   : > { %2047 = vmatpush3.bf16.msra.mxu0 %v1296_v12  ;;  %2048 = vmatprep.mubr.msk.bf16.mxu0 %vm2182_vm0, %v2181_v3 }
  0xd8   : > { %2058 = vmatprep.subr.bf16.mxu0 %v2181_v3  ;;  %2065 = vmatpush3.bf16.msra.mxu1 %v1449_v13  ;;  %v2452_v15 = vpop.f32.mrf.mxu1 }
  0xd9   : > { %2066 = vmatprep.mubr.msk.bf16.mxu1 %vm2182_vm0, %v2181_v3  ;;  %2076 = vmatprep.subr.bf16.mxu1 %v2181_v3 }
  0xda   : > { %v1936_v19 = vpop.f32.mrf.mxu1 }
  0xdc   : > { %v347_v22 = vpop.f32.mrf.mxu1 }
  0xde   : > { %2049 = vmatmul.mubr.msk.bf16.vlgmr.msra.gmra.mxu0 %vm256_vm2, %v1855_v17  ;;  %2067 = vmatmul.mubr.msk.bf16.vlgmr.msra.gmra.mxu1 %vm256_vm2, %v1861_v18  ;;  %v1937_v23 = vpop.f32.mrf.mxu1 }
  0xdf   : > { %2059 = vmatpush3.bf16.msra.mxu0 %v1398_v20  ;;  %2060 = vmatprep.mubr.msk.bf16.mxu0 %vm2182_vm0, %v2181_v3 }
  0xe0   : > { %2070 = vmatprep.subr.bf16.mxu0 %v2181_v3  ;;  %2077 = vmatpush3.bf16.msra.mxu1 %v1551_v21 }
  0xe1   : > { %2078 = vmatprep.mubr.msk.bf16.mxu1 %vm2182_vm0, %v2181_v3 }
  0xe6   : > { %2061 = vmatmul.mubr.msk.bf16.vlgmr.msra.gmra.mxu0 %vm256_vm2, %v1859_v25  ;;  %2079 = vmatmul.mubr.msk.bf16.vlgmr.msra.gmra.mxu1 %vm256_vm2, %v1865_v26 }
  0xe7   : > { %2071 = vmatpush3.bf16.msra.mxu0 %v1500_v27  ;;  %2072 = vmatprep.mubr.msk.bf16.mxu0 %vm2182_vm0, %v2181_v3 }
  0xe8   : > { %2082 = vmatprep.subr.bf16.mxu0 %v2181_v3 }
  0xee   : > { %2073 = vmatmul.mubr.msk.bf16.vlgmr.msra.gmra.mxu0 %vm256_vm2, %v1863_v29 }
  0xef   : > { %2083 = vmatpush3.bf16.msra.mxu0 %v1602_v30  ;;  %2084 = vmatprep.mubr.msk.bf16.mxu0 %vm2182_vm0, %v2181_v3 }
  0xf6   : > { %2085 = vmatmul.mubr.msk.bf16.vlgmr.msra.gmra.mxu0 %vm256_vm2, %v1867_v31 }
 0x14e   : > { %v298_v32 = vpop.f32.mrf.mxu0  ;;  %v445_v33 = vpop.f32.mrf.mxu1 }
 0x14f   : > { %v345_v63 = vadd.f32 %v2452_v15, %v298_v32 }
 0x150   : > { %v1930_v34 = vpop.f32.mrf.mxu0  ;;  %v1948_v35 = vpop.f32.mrf.mxu1 }
 0x152   : > { %v301_v36 = vpop.f32.mrf.mxu0  ;;  %v448_v37 = vpop.f32.mrf.mxu1 }
 0x154   : > { %v1931_v38 = vpop.f32.mrf.mxu0  ;;  %v1949_v39 = vpop.f32.mrf.mxu1 }
 0x156   : > { %v394_v40 = vpop.f32.mrf.mxu0  ;;  %v547_v41 = vpop.f32.mrf.mxu1 }
 0x157   : > { %v400_v2 = vadd.f32 %v394_v40, %v345_v63 }
 0x158   : > { %v1942_v42 = vpop.f32.mrf.mxu0  ;;  %v1960_v43 = vpop.f32.mrf.mxu1 }
 0x159   : > { %v451_v8 = vadd.f32 %v445_v33, %v400_v2 }
 0x15a   : > { %v397_v44 = vpop.f32.mrf.mxu0  ;;  %v550_v3 = vpop.f32.mrf.mxu1 }
 0x15c   : > { %v1943_v45 = vpop.f32.mrf.mxu0  ;;  %v1961_v46 = vpop.f32.mrf.mxu1 }
 0x15e   : > { %v496_v47 = vpop.f32.mrf.mxu0  ;;  %v649_v48 = vpop.f32.mrf.mxu1 }
 0x15f   : > { %v502_v11 = vadd.f32 %v496_v47, %v451_v8 }
 0x160   : > { %v1954_v49 = vpop.f32.mrf.mxu0  ;;  %v1972_v50 = vpop.f32.mrf.mxu1 }
 0x161   : > { %v553_v17 = vadd.f32 %v547_v41, %v502_v11 }
 0x162   : > { %v499_v51 = vpop.f32.mrf.mxu0  ;;  %v652_v52 = vpop.f32.mrf.mxu1 }
 0x164   : > { %v1955_v53 = vpop.f32.mrf.mxu0  ;;  %v1973_v54 = vpop.f32.mrf.mxu1 }
 0x166   : > { %v598_v55 = vpop.f32.mrf.mxu0  ;;  %v753_v56 = vpop.f32.mrf.mxu1 }
 0x167   : > { %v604_v20 = vadd.f32 %v598_v55, %v553_v17 }
 0x168   : > { %v1966_v57 = vpop.f32.mrf.mxu0  ;;  %v1984_v58 = vpop.f32.mrf.mxu1 }
 0x169   : > { %v655_v24 = vadd.f32 %v649_v48, %v604_v20 }
 0x16a   : > { %v601_v59 = vpop.f32.mrf.mxu0  ;;  %v756_v60 = vpop.f32.mrf.mxu1 }
 0x16c   : > { %v1967_v61 = vpop.f32.mrf.mxu0  ;;  %v1985_v62 = vpop.f32.mrf.mxu1 }
 0x16e   : > { %v700_v0 = vpop.f32.mrf.mxu0  ;;  %v863_v1 = vpop.f32.mrf.mxu1 }
 0x16f   : > { %v706_v27 = vadd.f32 %v700_v0, %v655_v24 }
 0x170   : > { %v1978_v4 = vpop.f32.mrf.mxu0  ;;  %v1996_v5 = vpop.f32.mrf.mxu1 }
 0x171   : > { %v759_v32 = vadd.f32 %v753_v56, %v706_v27 }
 0x172   : > { %v703_v6 = vpop.f32.mrf.mxu0  ;;  %v866_v7 = vpop.f32.mrf.mxu1 }
 0x174   : > { %v1979_v9 = vpop.f32.mrf.mxu0  ;;  %v1997_v10 = vpop.f32.mrf.mxu1 }
 0x176   : > { %v812_v12 = vpop.f32.mrf.mxu0  ;;  %v965_v13 = vpop.f32.mrf.mxu1 }
 0x177   : > { %v818_v35 = vadd.f32 %v812_v12, %v759_v32 }
 0x178   : > { %v1990_v14 = vpop.f32.mrf.mxu0  ;;  %v2008_v16 = vpop.f32.mrf.mxu1 }
 0x179   : > { %v869_v40 = vadd.f32 %v863_v1, %v818_v35 }
 0x17a   : > { %v815_v18 = vpop.f32.mrf.mxu0  ;;  %v968_v19 = vpop.f32.mrf.mxu1 }
 0x17c   : > { %v1991_v15 = vpop.f32.mrf.mxu0  ;;  %v2009_v21 = vpop.f32.mrf.mxu1 }
 0x17e   : > { %v914_v22 = vpop.f32.mrf.mxu0  ;;  %v1067_v23 = vpop.f32.mrf.mxu1 }
 0x17f   : > { %v920_v43 = vadd.f32 %v914_v22, %v869_v40 }
 0x180   : > { %v2002_v25 = vpop.f32.mrf.mxu0  ;;  %v2020_v26 = vpop.f32.mrf.mxu1 }
 0x181   : > { %v971_v47 = vadd.f32 %v965_v13, %v920_v43 }
 0x182   : > { %v917_v28 = vpop.f32.mrf.mxu0  ;;  %v1070_v29 = vpop.f32.mrf.mxu1 }
 0x184   : > { %v2003_v30 = vpop.f32.mrf.mxu0  ;;  %v2021_v31 = vpop.f32.mrf.mxu1 }
 0x185   : > { %v1869_v30 = vld [vmem:[%s2522_s2] ss:$0 sm:$0xff] }
 0x186   : > { %v1016_v33 = vpop.f32.mrf.mxu0  ;;  %v1169_v34 = vpop.f32.mrf.mxu1 }
 0x187   : > { %v1022_v50 = vadd.f32 %v1016_v33, %v971_v47 }
 0x188   : > { %v2014_v36 = vpop.f32.mrf.mxu0  ;;  %v2032_v37 = vpop.f32.mrf.mxu1 }
 0x189   : > { %v1073_v55 = vadd.f32 %v1067_v23, %v1022_v50 }
 0x18a   : > { %v1019_v38 = vpop.f32.mrf.mxu0  ;;  %v1172_v39 = vpop.f32.mrf.mxu1 }
 0x18c   : > { %v2015_v41 = vpop.f32.mrf.mxu0  ;;  %v2033_v42 = vpop.f32.mrf.mxu1 }
 0x18e   : > { %v1118_v44 = vpop.f32.mrf.mxu0  ;;  %v1281_v3 = vpop.f32.mrf.mxu1 }
 0x18f   : > { %v1124_v58 = vadd.f32 %v1118_v44, %v1073_v55 }
 0x190   : > { %v2026_v45 = vpop.f32.mrf.mxu0  ;;  %v2044_v46 = vpop.f32.mrf.mxu1 }
 0x191   : > { %v1175_v63 = vadd.f32 %v1169_v34, %v1124_v58 }
 0x192   : > { %v1121_v48 = vpop.f32.mrf.mxu0  ;;  %v1284_v49 = vpop.f32.mrf.mxu1 }
 0x194   : > { %v2027_v51 = vpop.f32.mrf.mxu0  ;;  %v2045_v52 = vpop.f32.mrf.mxu1 }
 0x196   : > { %v1222_v53 = vpop.f32.mrf.mxu0  ;;  %v1383_v54 = vpop.f32.mrf.mxu1 }
 0x197   : > { %v1228_v2 = vadd.f32 %v1222_v53, %v1175_v63 }
 0x198   : > { %v2038_v56 = vpop.f32.mrf.mxu0  ;;  %v2056_v57 = vpop.f32.mrf.mxu1 }
 0x199   : > { %v1287_v8 = vadd.f32 %v1281_v3, %v1228_v2 }
 0x19a   : > { %v1225_v59 = vpop.f32.mrf.mxu0  ;;  %v1386_v60 = vpop.f32.mrf.mxu1 }
 0x19c   : > { %v2039_v61 = vpop.f32.mrf.mxu0  ;;  %v2057_v62 = vpop.f32.mrf.mxu1 }
 0x19e   : > { %v1332_v0 = vpop.f32.mrf.mxu0  ;;  %v1485_v1 = vpop.f32.mrf.mxu1 }
 0x19f   : > { %v1338_v11 = vadd.f32 %v1332_v0, %v1287_v8 }
 0x1a0   : > { %v2050_v4 = vpop.f32.mrf.mxu0  ;;  %v2068_v5 = vpop.f32.mrf.mxu1 }
 0x1a1   : > { %v1389_v17 = vadd.f32 %v1383_v54, %v1338_v11 }
 0x1a2   : > { %v1335_v6 = vpop.f32.mrf.mxu0  ;;  %v1488_v7 = vpop.f32.mrf.mxu1 }
 0x1a4   : > { %v2051_v9 = vpop.f32.mrf.mxu0  ;;  %v2069_v10 = vpop.f32.mrf.mxu1 }
 0x1a6   : > { %v1434_v12 = vpop.f32.mrf.mxu0  ;;  %v1587_v13 = vpop.f32.mrf.mxu1 }
 0x1a7   : > { %v1440_v20 = vadd.f32 %v1434_v12, %v1389_v17 }
 0x1a8   : > { %v2062_v14 = vpop.f32.mrf.mxu0  ;;  %v2080_v16 = vpop.f32.mrf.mxu1 }
 0x1a9   : > { %v1491_v23 = vadd.f32 %v1485_v1, %v1440_v20 }
 0x1aa   : > { %v1437_v18 = vpop.f32.mrf.mxu0  ;;  %v1590_v19 = vpop.f32.mrf.mxu1 }
 0x1ac   : > { %v2063_v15 = vpop.f32.mrf.mxu0  ;;  %v2081_v21 = vpop.f32.mrf.mxu1 }
 0x1ae   : > { %v1536_v22 = vpop.f32.mrf.mxu0 }
 0x1af   : > { %v1542_v25 = vadd.f32 %v1536_v22, %v1491_v23 }
 0x1b0   : > { %v2074_v24 = vpop.f32.mrf.mxu0 }
 0x1b1   : > { %v1593_v28 = vadd.f32 %v1587_v13, %v1542_v25 }
 0x1b2   : > { %v1539_v26 = vpop.f32.mrf.mxu0 }
 0x1b4   : > { %v2075_v27 = vpop.f32.mrf.mxu0 }
 0x1b6   : > { %v1638_v29 = vpop.f32.mrf.mxu0 }
 0x1b7   : > { %v1644_v31 = vadd.f32 %v1638_v29, %v1593_v28 }
 0x1b8   : > { %v2086_v32 = vpop.f32.mrf.mxu0 }
 0x1b9   : > { %v1654_v33 = vmul.f32 %v1869_v30, %v1644_v31  ;;  %1646 = vst.msk [vmem:[%s230_s12] sm:$0xff] %vm1645_vm3, %v1644_v31 }
 0x1ba   : > { %v1641_v34 = vpop.f32.mrf.mxu0 }
 0x1bb   : > { %v1655_v35 = vsel %vm1645_vm3, %v1654_v33, 0.0  ;;  %v1660_v36 = vmul.f32 %v1654_v33, %v1644_v31 }
 0x1bc   : > { %v2087_v37 = vpop.f32.mrf.mxu0  ;;  %1656 = vadd.xlane.f32.xlu0 %v1655_v35 }
 0x1bd   : > { %v1661_v38 = vsel %vm1645_vm3, %v1660_v36, 0.0 }
 0x1be   : > { %1662 = vadd.xlane.f32.xlu1 %v1661_v38 }
 0x245   : > { %v1657_v39 = vpop.xlane.xlu0 %1656 }
 0x246   : > { %1659 = vst.msk [vmem:[%s238_s22] sm:$0xff] %vm1658_vm4, %v1657_v39 }
 0x247   : > { %v1663_v40 = vpop.xlane.xlu1 %1662 }
 0x248   : > { %1665 = vst.msk [vmem:[%s238_s22] sm:$0xff] %vm1664_vm5, %v1663_v40 }
 0x249 PF: > { %s15_s19 = sadd.s32 1, %s2178_s19   ;;  %s2525_s15 = smov %s2170_s17 }
 0x24a   : > { %p12_p7 = scmp.ge.s32.totalorder %s15_s19, 18   ;;  %s2526_s16 = smov %s2174_s18 }
 0x24b   : > { %s2527_s17 = smov %s2530_s20  ;;  %s2528_s18 = smov %s2534_s21 }
 0x24c   :  { %14 = sbr.rel (!%p12_p7) target bundleno = 3 (0x3), region = 103 }

</bundles_post_ra>
